<compile_context>
chip_gen: v6e
topology: v6e:2x2x1
jax: 0.10.0
libtpu: 0.0.40
codegen_flags: <defaults>
</compile_context>

<pallas_src>
import jax
import jax.numpy as jnp
from jax.experimental import pallas as pl
from jax.experimental.pallas import tpu as pltpu


def _round_up(v: int, m: int) -> int:
    return (v + m - 1) // m * m


def _pick_base_tiles(hidden: int, out_features: int):
    """N/K tile sizes chosen from the weight shape only, so the padded weight layout
    can be prepared and cached once per weight (not per forward)."""
    # N (lane axis of out / W.T): multiples of 128; 256-multiples for the 256x256 MXU.
    if out_features >= 1024:
        tn = 1024
    elif out_features >= 256:
        tn = _round_up(out_features, 256)
    else:
        tn = _round_up(out_features, 128)
    # K (lane axis of X / sublane axis of W.T): fewer K steps -> less f32 accumulator
    # read/write traffic (vst is the scarce VLIW slot) and less per-step grid overhead.
    if hidden > 2048:
        tk = 1024
    elif hidden >= 256:
        tk = _round_up(hidden, 256)
    else:
        tk = _round_up(hidden, 128)
    return tn, tk


def prepare_sparse_linear(coo_indices, coo_values, weight_shape, bias):
    """Densify the COO weight (O, H) directly into padded, transposed (h_pad, o_pad)
    bf16 layout and pad the bias. Do this once per weight and cache it — it is NOT
    part of the per-forward hot path."""
    out_features, hidden = weight_shape
    tn, tk = _pick_base_tiles(hidden, out_features)
    h_pad = _round_up(hidden, tk)
    o_pad = _round_up(out_features, tn)

    # Scatter-add duplicates in float32 (torch coalesce), then cast once to bf16.
    wt = jnp.zeros((h_pad, o_pad), dtype=jnp.float32)
    wt = wt.at[coo_indices[1], coo_indices[0]].add(coo_values.astype(jnp.float32))
    wt = wt.astype(jnp.bfloat16)

    if bias is None:
        bias = jnp.zeros((out_features,), dtype=jnp.bfloat16)
    bias2d = jnp.zeros((1, o_pad), dtype=jnp.bfloat16)
    bias2d = bias2d.at[0, :out_features].set(bias.astype(jnp.bfloat16))
    return wt, bias2d


def _sparse_linear_kernel(x_ref, wt_ref, b_ref, o_ref, acc_ref):
    k = pl.program_id(2)

    @pl.when(k == 0)
    def _():
        # Fold the bias into the accumulator init (no epilogue VPU add needed).
        acc_ref[...] = jnp.broadcast_to(
            b_ref[...].astype(jnp.float32), acc_ref.shape)

    # bf16 x bf16 -> f32 accumulation on the MXU; no operand upcasts.
    acc_ref[...] += jnp.dot(x_ref[...], wt_ref[...],
                            preferred_element_type=jnp.float32)

    @pl.when(k == pl.num_programs(2) - 1)
    def _():
        o_ref[...] = acc_ref[...].astype(o_ref.dtype)


def sparse_linear(x, wt_padded, bias_padded, hidden, out_features):
    """x: (..., hidden) bf16; wt_padded: pre-padded dense W.T of shape (h_pad, o_pad);
    bias_padded: (1, o_pad). Returns (..., out_features)."""
    orig_shape = x.shape
    assert orig_shape[-1] == hidden
    h_pad, o_pad = wt_padded.shape
    tn, tk = _pick_base_tiles(hidden, out_features)
    assert h_pad == _round_up(hidden, tk) and o_pad == _round_up(out_features, tn), \
        "wt_padded must come from prepare_sparse_linear()"

    x_flat = x.reshape(-1, hidden)
    n_rows = x_flat.shape[0]

    # M tile: bf16 packs two rows per sublane -> multiple of 16 (not 8).
    if n_rows >= 512:
        tm = 512
    elif n_rows >= 256:
        tm = 256
    else:
        tm = _round_up(n_rows, 16)
    n_pad = _round_up(n_rows, tm)
    m_blocks = n_pad // tm

    # v7x megacore: with a single M block (decode), keep >= 2 N blocks so the
    # 'parallel' N axis shards across both TensorCores. o_pad stays a multiple of tn.
    if m_blocks == 1:
        while o_pad // tn < 2 and tn >= 256:
            tn //= 2

    k_steps = h_pad // tk
    n_blocks = o_pad // tn
    grid = (m_blocks, n_blocks, k_steps)

    # Pad activations only (cheap relative to the weight); zeros add nothing.
    if (n_pad, h_pad) != (n_rows, hidden):
        x_flat = jnp.pad(x_flat, ((0, n_pad - n_rows), (0, h_pad - hidden)))

    # Weight stream: 3-deep buffering in the memory-bound regime (single M block,
    # several K steps) to hide DMA issue latency; 2-deep otherwise.
    if m_blocks == 1 and k_steps >= 3:
        wt_spec = pl.BlockSpec((tk, tn), lambda i, j, k: (k, j),
                               pipeline_mode=pl.Buffered(3))
        wt_bufs = 3
    else:
        wt_spec = pl.BlockSpec((tk, tn), lambda i, j, k: (k, j))
        wt_bufs = 2

    itemsize = 2  # bf16
    vmem_needed = ((2 * tm * tk + wt_bufs * tk * tn + 2 * tm * tn) * itemsize
                   + tm * tn * 4 + 2 * 1 * tn * itemsize)
    vmem_limit = None
    if vmem_needed > (14 << 20):  # above v5e's 16 MiB scoped default (with margin)
        vmem_limit = int(min(vmem_needed + (8 << 20), 48 << 20))

    cost = pl.CostEstimate(
        flops=2 * n_pad * o_pad * h_pad,
        transcendentals=0,
        bytes_accessed=(n_pad * h_pad * itemsize              # X read
                        + h_pad * o_pad * itemsize * m_blocks  # W.T re-streamed per M tile
                        + n_pad * o_pad * itemsize))           # Y write

    y_pad = pl.pallas_call(
        _sparse_linear_kernel,
        out_shape=jax.ShapeDtypeStruct((n_pad, o_pad), x.dtype),
        grid_spec=pltpu.PrefetchScalarGridSpec(
            num_scalar_prefetch=0,
            grid=grid,
            in_specs=[
                pl.BlockSpec((tm, tk), lambda i, j, k: (i, k)),   # X tile
                wt_spec,                                          # W.T tile
                pl.BlockSpec((1, tn), lambda i, j, k: (0, j)),    # bias tile
            ],
            out_specs=pl.BlockSpec((tm, tn), lambda i, j, k: (i, j)),
            scratch_shapes=[pltpu.VMEM((tm, tn), jnp.float32)],
        ),
        compiler_params=pltpu.CompilerParams(
            dimension_semantics=("parallel", "parallel", "arbitrary"),
            vmem_limit_bytes=vmem_limit),
        cost_estimate=cost,
    )(x_flat, wt_padded, bias_padded)

    y_flat = y_pad[:n_rows, :out_features]
    return y_flat.reshape(*orig_shape[:-1], out_features)


if __name__ == "__main__":
    batch_size, seq_len, hidden, out_features = 2, 8, 32, 48
    sparsity = 0.7  # ~70% of weight entries pruned to zero

    key = jax.random.PRNGKey(0)
    kx, kw, kb, kmask = jax.random.split(key, 4)

    # Inputs (fp16 in PyTorch -> bf16 on TPU).
    x = jax.random.normal(
        kx, (batch_size, seq_len, hidden), dtype=jnp.float32).astype(jnp.bfloat16)

    # Build a deterministic sparse COO weight (out_features, hidden).
    w_full = jax.random.normal(kw, (out_features, hidden), dtype=jnp.float32)
    keep = jax.random.uniform(kmask, (out_features, hidden)) > sparsity
    w_sparse_dense = jnp.where(keep, w_full, 0.0).astype(jnp.bfloat16)
    rows, cols = jnp.nonzero(w_sparse_dense != 0)       # eager only (dynamic shape)
    coo_indices = jnp.stack([rows, cols], axis=0)       # (2, nnz)
    coo_values = w_sparse_dense[rows, cols]             # (nnz,)

    bias = jax.random.normal(kb, (out_features,), dtype=jnp.float32).astype(jnp.bfloat16)

    # Densify + pad ONCE (cache per weight in real use), then run the forward kernel.
    wt_padded, bias_padded = prepare_sparse_linear(
        coo_indices, coo_values, (out_features, hidden), bias)
    y = sparse_linear(x, wt_padded, bias_padded, hidden, out_features)
    y = jax.block_until_ready(y)

    # Sanity check against plain JAX reference (dense math is identical).
    y_ref = (x.astype(jnp.float32).reshape(-1, hidden)
             @ w_sparse_dense.astype(jnp.float32).T
             + bias.astype(jnp.float32)).reshape(batch_size, seq_len, out_features)
    assert y.shape == (batch_size, seq_len, out_features)
    assert jnp.allclose(y.astype(jnp.float32), y_ref, atol=1e-1, rtol=2e-2)

    print("KERNEL_OK")
</pallas_src>

<mosaic_0001>
module attributes {stable_mosaic.version = 11 : i64} {
  func.func @_sparse_linear_kernel(%arg0: i32, %arg1: i32, %arg2: i32, %arg3: memref<16x128xbf16, #tpu.memory_space<vmem>>, %arg4: memref<128x128xbf16, #tpu.memory_space<vmem>>, %arg5: memref<1x128xbf16, #tpu.memory_space<vmem>>, %arg6: memref<16x128xbf16, #tpu.memory_space<vmem>>, %arg7: memref<16x128xf32, #tpu.memory_space<vmem>>) attributes {dimension_semantics = [#tpu.dimension_semantics<parallel>, #tpu.dimension_semantics<parallel>, #tpu.dimension_semantics<arbitrary>], iteration_bounds = array<i64: 1, 1, 1>, scalar_prefetch = 0 : i64, scratch_operands = 1 : i64, tpu.core_type = #tpu.core_type<tc>, window_params = [{transform_indices = @transform_0, window_bounds = array<i64: 16, 128>}, {transform_indices = @transform_1, window_bounds = array<i64: 128, 128>}, {transform_indices = @transform_2, window_bounds = array<i64: 1, 128>}, {transform_indices = @transform_3, window_bounds = array<i64: 16, 128>}]} {
    %c0_i32 = arith.constant 0 : i32
    %0 = arith.cmpi eq, %arg2, %c0_i32 : i32
    %1 = arith.extui %0 : i1 to i32
    %c0_i32_0 = arith.constant 0 : i32
    %2 = arith.cmpi ne, %1, %c0_i32_0 : i32
    scf.if %2 {
      %c0_10 = arith.constant 0 : index
      %c0_11 = arith.constant 0 : index
      %12 = vector.load %arg5[%c0_10, %c0_11] : memref<1x128xbf16, #tpu.memory_space<vmem>>, vector<1x128xbf16>
      %13 = arith.extf %12 : vector<1x128xbf16> to vector<1x128xf32>
      %14 = vector.shape_cast %13 : vector<1x128xf32> to vector<1x128xf32>
      %15 = vector.broadcast %14 : vector<1x128xf32> to vector<16x128xf32>
      %c0_12 = arith.constant 0 : index
      %c0_13 = arith.constant 0 : index
      %16 = vector.load %arg7[%c0_12, %c0_13] : memref<16x128xf32, #tpu.memory_space<vmem>>, vector<16x128xf32>
      tpu.vector_store %arg7[%c0_12, %c0_13], %15 {strides = array<i32>} : memref<16x128xf32, #tpu.memory_space<vmem>>, vector<16x128xf32>,
    } else {
    }
    %c0 = arith.constant 0 : index
    %c0_1 = arith.constant 0 : index
    %3 = vector.load %arg7[%c0, %c0_1] : memref<16x128xf32, #tpu.memory_space<vmem>>, vector<16x128xf32>
    %c0_2 = arith.constant 0 : index
    %c0_3 = arith.constant 0 : index
    %4 = vector.load %arg3[%c0_2, %c0_3] : memref<16x128xbf16, #tpu.memory_space<vmem>>, vector<16x128xbf16>
    %c0_4 = arith.constant 0 : index
    %c0_5 = arith.constant 0 : index
    %5 = vector.load %arg4[%c0_4, %c0_5] : memref<128x128xbf16, #tpu.memory_space<vmem>>, vector<128x128xbf16>
    %cst = arith.constant dense<0.000000e+00> : vector<16x128xf32>
    %6 = tpu.matmul %4, %5, %cst {dimension_numbers = #tpu.dot_dimension_numbers<[1], [0], [0], [1], [0, 0, 1, 1], [], []>} : vector<16x128xbf16>, vector<128x128xbf16>, vector<16x128xf32> -> vector<16x128xf32>
    %7 = arith.addf %3, %6 : vector<16x128xf32>
    %c0_6 = arith.constant 0 : index
    %c0_7 = arith.constant 0 : index
    %8 = vector.load %arg7[%c0_6, %c0_7] : memref<16x128xf32, #tpu.memory_space<vmem>>, vector<16x128xf32>
    tpu.vector_store %arg7[%c0_6, %c0_7], %7 {strides = array<i32>} : memref<16x128xf32, #tpu.memory_space<vmem>>, vector<16x128xf32>,
    %c0_i32_8 = arith.constant 0 : i32
    %9 = arith.cmpi eq, %arg2, %c0_i32_8 : i32
    %10 = arith.extui %9 : i1 to i32
    %c0_i32_9 = arith.constant 0 : i32
    %11 = arith.cmpi ne, %10, %c0_i32_9 : i32
    scf.if %11 {
      %c0_10 = arith.constant 0 : index
      %c0_11 = arith.constant 0 : index
      %12 = vector.load %arg7[%c0_10, %c0_11] : memref<16x128xf32, #tpu.memory_space<vmem>>, vector<16x128xf32>
      %13 = arith.truncf %12 : vector<16x128xf32> to vector<16x128xbf16>
      %c0_12 = arith.constant 0 : index
      %c0_13 = arith.constant 0 : index
      %14 = vector.load %arg6[%c0_12, %c0_13] : memref<16x128xbf16, #tpu.memory_space<vmem>>, vector<16x128xbf16>
      tpu.vector_store %arg6[%c0_12, %c0_13], %13 {strides = array<i32>} : memref<16x128xbf16, #tpu.memory_space<vmem>>, vector<16x128xbf16>,
    } else {
    }
    return
  }
  func.func @transform_0(%arg0: i32, %arg1: i32, %arg2: i32) -> (i32, i32) {
    %c0_i32 = arith.constant 0 : i32
    return %arg0, %arg2 : i32, i32
  }
  func.func @transform_1(%arg0: i32, %arg1: i32, %arg2: i32) -> (i32, i32) {
    %c0_i32 = arith.constant 0 : i32
    return %arg2, %arg1 : i32, i32
  }
  func.func @transform_2(%arg0: i32, %arg1: i32, %arg2: i32) -> (i32, i32) {
    %c0_i32 = arith.constant 0 : i32
    %c0_i32_0 = arith.constant 0 : i32
    return %c0_i32, %arg1 : i32, i32
  }
  func.func @transform_3(%arg0: i32, %arg1: i32, %arg2: i32) -> (i32, i32) {
    %c0_i32 = arith.constant 0 : i32
    return %arg0, %arg1 : i32, i32
  }
}

</mosaic_0001>

<bundles_post_ra>
// kernel: tpu_custom_call.1
= control target key start
LH: loop header
LB: loop body
LE: loop exit
PB: predicated region body
PF: predicated region fallthrough
CT: control target
= control target key end

     0   :  { %8 = vsyncpa [#allocation4], 0  ;;  %s385_s0 = inlined_call_operand.hbm [shape: bf16[16,128], index: 0, kind: input, shape index: {}]   ;;  %s386_s1 = inlined_call_operand.hbm [shape: bf16[128,128], index: 1, kind: input, shape index: {}]   ;;  %s387_s2 = inlined_call_operand.vmem [shape: bf16[1,128], index: 2, kind: input, shape index: {}]   ;;  %s388_s3 = inlined_call_operand.hbm [shape: bf16[16,128], index: 3, kind: output, shape index: {}]  }
   0x1   :  { %9 = vsyncpa [#allocation7], 0 }
   0x2   :  { %10 = vsyncpa [#allocation5], 0  ;;  %s337_s12 = smov [#allocation3]  }
   0x3   :  { %s16_s13 = sshll.u32 %s337_s12, 4  ;;  %s17_s13 = int_to_ptr.vmem [resolvable:$true] %s16_s13 }
   0x4   :  { %s279_s14 = scalar_lea.vmem %s17_s13, 128  ;;  %p284_p1 = scmp.lt.s32.totalorder %s17_s13, %s17_s13 }
   0x5   :  { %p280_p0 = scmp.ne.s32.totalorder %s17_s13, %s279_s14  ;;  %p285_p2 = scmp.lt.s32.totalorder %s279_s14, %s279_s14 }
   0x7   :  { %p286_p3 = por %p285_p2, %p284_p1 }
   0x9   :  { %p287_p4 = pnand %p286_p3, %p280_p0 }
   0xb   :  { %290 = shalt.err (!%p287_p4)
}
   0xc   :  { %s338_s15 = smov 64   ;;  %s339_s16 = smov 4  }
   0xd   :  { %22 = dma.hbm_to_vmem [thread:$0]  %s385_s0, 128, %s17_s13, [#allocation4], %s338_s15, %s338_s15, %s339_s16  }
   0xe   :  { %s340_s19 = smov [#allocation6]  }
   0xf   :  { %s28_s20 = sshll.u32 %s340_s19, 4  ;;  %s29_s20 = int_to_ptr.vmem [resolvable:$true] %s28_s20 }
  0x10   :  { %s299_s21 = scalar_lea.vmem %s29_s20, 1024  ;;  %p304_p6 = scmp.lt.s32.totalorder %s29_s20, %s29_s20 }
  0x11   :  { %p300_p5 = scmp.ne.s32.totalorder %s29_s20, %s299_s21  ;;  %p305_p7 = scmp.lt.s32.totalorder %s299_s21, %s299_s21 }
  0x13   :  { %p306_p8 = por %p305_p7, %p304_p6 }
  0x15   :  { %p307_p9 = pnand %p306_p8, %p300_p5 }
  0x17   :  { %310 = shalt.err (!%p307_p9)
}
  0x18   :  { %34 = dma.hbm_to_vmem [thread:$0]  %s386_s1, 1024, %s29_s20, [#allocation7], %s338_s15, %s338_s15, %s339_s16  }
  0x19   :  { %331 = dma.done.wait [#allocation4], 128  }
  0x1a   :  { %332 = vsyncadd [#allocation4], 4294967168 }
  0x1b   :  { %333 = dma.done.wait [#allocation7], 1024  }
  0x1c   :  { %334 = vsyncadd [#allocation7], 4294966272  ;;  %v341_v0 = vmov 0.0   ;;  %vm342_vm0 = vmmov 0   ;;  %v262_v1 = vld [vmem:[#allocation6 + $0x38] sm:$0xff]   ;;  %v263_v2 = vld [vmem:[#allocation6 + $0x30] sm:$0xff]   ;;  %v50_v10 = vlaneseq }
  0x1d   :  { %235 = vmatprep.subr.bf16.mxu0 %v341_v0  ;;  %251 = vmatprep.mubr.msk.bf16.mxu0 %vm342_vm0, %v341_v0  ;;  %v264_v3 = vld [vmem:[#allocation6 + $0x28] sm:$0xff]   ;;  %v265_v4 = vld [vmem:[#allocation6 + $0x20] sm:$0xff]   ;;  %v266_v5 = vld [vmem:[#allocation6 + $0x18] sm:$0xff]   ;;  %s343_s24 = smov [#allocation8]  }
  0x1e   :  { %236 = vmatpush3.bf16.msra.mxu0 %v262_v1  ;;  %v267_v6 = vld [vmem:[#allocation6 + $0x10] sm:$0xff]   ;;  %v268_v7 = vld [vmem:[#allocation6 + $0x8] sm:$0xff]   ;;  %v269_v8 = vld [vmem:[#allocation6] sm:$0xff]   ;;  %v51_v11 = vshrl.u32 %v50_v10, 7  ;;  %s195_s25 = sshll.u32 %s343_s24, 4  ;;  %s196_s25 = int_to_ptr.vmem [resolvable:$true] %s195_s25 }
  0x1f   :  { %237 = vmatprep.subr.bf16.mxu0 %v341_v0  ;;  %v270_v9 = vld [vmem:[#allocation3] sm:$0xff]   ;;  %s311_s26 = scalar_lea.vmem %s196_s25, 128  ;;  %p316_p11 = scmp.lt.s32.totalorder %s196_s25, %s196_s25 }
  0x20   :  { %v48_v12 = vld [vmem:[%s387_s2] sm:$0x1]  ;;  %v52_v14 = vsub.s32 0, %v51_v11  ;;  %p312_p10 = scmp.ne.s32.totalorder %s196_s25, %s311_s26  ;;  %p317_p12 = scmp.lt.s32.totalorder %s311_s26, %s311_s26 }
  0x21   :  { %v49_v13 = vunpack.c.l.bf16 %v48_v12 }
  0x22   :  { %238 = vmatpush3.bf16.msra.mxu0 %v263_v2  ;;  %p318_p13 = por %p317_p12, %p316_p11 }
  0x23   :  { %239 = vmatprep.subr.bf16.mxu0 %v341_v0  ;;  %v53_v16 = vrot.slane %v49_v13, %v52_v14 }
  0x24   :  { %p319_p0 = pnand %p318_p13, %p312_p10 }
  0x26   :  { %240 = vmatpush3.bf16.msra.mxu0 %v264_v3 }
  0x27   :  { %241 = vmatprep.subr.bf16.mxu0 %v341_v0 }
  0x2a   :  { %242 = vmatpush3.bf16.msra.mxu0 %v265_v4 }
  0x2b   :  { %243 = vmatprep.subr.bf16.mxu0 %v341_v0 }
  0x2e   :  { %244 = vmatpush3.bf16.msra.mxu0 %v266_v5 }
  0x2f   :  { %245 = vmatprep.subr.bf16.mxu0 %v341_v0 }
  0x32   :  { %246 = vmatpush3.bf16.msra.mxu0 %v267_v6 }
  0x33   :  { %247 = vmatprep.subr.bf16.mxu0 %v341_v0 }
  0x36   :  { %248 = vmatpush3.bf16.msra.mxu0 %v268_v7 }
  0x37   :  { %249 = vmatprep.subr.bf16.mxu0 %v341_v0 }
  0x3a   :  { %250 = vmatpush3.bf16.msra.mxu0 %v269_v8 }
  0x3d   :  { %252 = vmatmul.mubr.bf16.vlgmr.msra.gmra.mxu0 %v270_v9 }
  0xfd   :  { %v164_v15 = vpop.f32.mrf.mxu0 }
  0xfe   :  { %v171_v19 = vadd.f32 %v164_v15, %v53_v16 }
  0xff   :  { %v253_v17 = vpop.f32.mrf.mxu0 }
 0x101   :  { %v167_v18 = vpop.f32.mrf.mxu0 }
 0x102   :  { %v172_v20 = vadd.f32 %v167_v18, %v53_v16 }
 0x103   :  { %v254_v21 = vpop.f32.mrf.mxu0 }
 0x104   :  { %v224_v22 = vpack.c.bf16 %v172_v20, %v171_v19 }
 0x106   :  { %225 = vst [vmem:[#allocation8] sm:$0xff] %v224_v22  }
 0x107   :  { %322 = shalt.err (!%p319_p0)
}
 0x108   :  { %201 = dma.vmem_to_hbm [thread:$0]  %s196_s25, 128, %s388_s3, [#allocation5], %s338_s15, %s338_s15, %s339_s16  }
 0x109   :  { %335 = dma.done.wait [#allocation5], 128  }
 0x10a   :  { %336 = vsyncadd [#allocation5], 4294967168 }
 0x10b   :  { %205 = vsyncpa [#allocation4], 1 }
 0x10c   :  { %206 = vsyncpa [#allocation7], 1 }
 0x10d   :  { %207 = vsyncpa [#allocation5], 1 }

</bundles_post_ra>
